<compile_context>
chip_gen: v5e
topology: v5e:2x2
jax: 0.10.0
libtpu: 0.0.40
codegen_flags: <defaults>
</compile_context>

<pallas_src>
import functools

import jax
import jax.numpy as jnp
from jax.experimental import pallas as pl
from jax.experimental.pallas import tpu as pltpu


# ----------------------------------------------------------------------------
# Small helpers
# ----------------------------------------------------------------------------

def _round_up(x, m):
    return ((x + m - 1) // m) * m


def _pad_dim(arr, axis, target):
    pad = target - arr.shape[axis]
    if pad == 0:
        return arr
    cfg = [(0, 0)] * arr.ndim
    cfg[axis] = (0, pad)
    return jnp.pad(arr, cfg)


def _choose_tk(K, max_tk=512):
    """Largest multiple of 128 (<= max_tk) that divides K; else the full K."""
    if K <= max_tk or K % 128 != 0:
        return K
    tk = 128
    for cand in range(256, max_tk + 1, 128):
        if K % cand == 0:
            tk = cand
    return tk


def _choose_row_tile(m):
    for t in (512, 256, 128, 64, 32, 16, 8):
        if m % t == 0:
            return t
    return m


# ----------------------------------------------------------------------------
# Fused matmul + BN-bias (+residual) (+ReLU) Pallas kernel
# ----------------------------------------------------------------------------

def _fused_matmul_kernel(*refs, relu, has_res):
    # refs = (a, b, bias[, res], out, acc)
    if has_res:
        a_ref, b_ref, bias_ref, res_ref, o_ref, acc_ref = refs
    else:
        a_ref, b_ref, bias_ref, o_ref, acc_ref = refs

    k = pl.program_id(2)

    @pl.when(k == 0)
    def _zero():
        acc_ref[...] = jnp.zeros_like(acc_ref)

    acc_ref[...] += jnp.dot(a_ref[...], b_ref[...],
                            preferred_element_type=jnp.float32)

    @pl.when(k == pl.num_programs(2) - 1)
    def _epilogue():
        y = acc_ref[...] + bias_ref[...]          # f32 epilogue (v5e-safe)
        if has_res:
            y = y + res_ref[...].astype(jnp.float32)
        if relu:
            y = jnp.maximum(y, 0.0)
        o_ref[...] = y.astype(o_ref.dtype)


def fused_matmul_bn(a, b, bias, residual=None, relu=True):
    """act((a @ b) + bias [+ residual]).

    a: (M, K), b: (K, N) with BN scale already folded in, bias: (1, N) f32.
    bf16 MXU matmul with f32 accumulation; bf16 output.
    """
    M, K = a.shape
    K2, N = b.shape
    assert K == K2

    tm = min(512, _round_up(M, 8))
    tn = N if N < 128 else min(512, N)
    tk = _choose_tk(K)

    Mp = _round_up(M, tm)
    Np = _round_up(N, tn)
    Kp = _round_up(K, tk)          # tk divides K by construction -> Kp == K

    a_p = _pad_dim(_pad_dim(a, 0, Mp), 1, Kp).astype(jnp.bfloat16)
    b_p = _pad_dim(_pad_dim(b, 0, Kp), 1, Np).astype(jnp.bfloat16)
    bias_p = _pad_dim(bias, 1, Np).astype(jnp.float32)

    has_res = residual is not None
    inputs = [a_p, b_p, bias_p]
    in_specs = [
        pl.BlockSpec((tm, tk), lambda i, j, k: (i, k)),
        pl.BlockSpec((tk, tn), lambda i, j, k: (k, j)),
        pl.BlockSpec((1, tn), lambda i, j, k: (0, j)),
    ]
    if has_res:
        r_p = _pad_dim(_pad_dim(residual, 0, Mp), 1, Np).astype(jnp.bfloat16)
        inputs.append(r_p)
        in_specs.append(pl.BlockSpec((tm, tn), lambda i, j, k: (i, j)))

    grid = (Mp // tm, Np // tn, Kp // tk)

    flops = 2 * Mp * Np * Kp
    bytes_accessed = (a_p.size + b_p.size) * 2 + Mp * Np * 2 \
        + (Mp * Np * 2 if has_res else 0) + Np * 4

    out = pl.pallas_call(
        functools.partial(_fused_matmul_kernel, relu=relu, has_res=has_res),
        out_shape=jax.ShapeDtypeStruct((Mp, Np), jnp.bfloat16),
        grid=grid,
        in_specs=in_specs,
        out_specs=pl.BlockSpec((tm, tn), lambda i, j, k: (i, j)),
        scratch_shapes=[pltpu.VMEM((tm, tn), jnp.float32)],
        compiler_params=pltpu.CompilerParams(
            dimension_semantics=("parallel", "parallel", "arbitrary")),
        cost_estimate=pl.CostEstimate(
            flops=flops, transcendentals=0, bytes_accessed=bytes_accessed),
    )(*inputs)

    if Mp != M or Np != N:
        out = out[:M, :N]
    return out


# ----------------------------------------------------------------------------
# Pooling kernels
# ----------------------------------------------------------------------------

def _maxpool9_kernel(*refs):
    o_ref = refs[-1]
    m = refs[0][...]
    for r in refs[1:-1]:
        m = jnp.maximum(m, r[...])
    o_ref[...] = m


def _global_avg_kernel(x_ref, o_ref):
    o_ref[...] = jnp.mean(x_ref[...].astype(jnp.float32), axis=1)


# ----------------------------------------------------------------------------
# Conv / pool wrappers (im2col slicing glue in JAX, compute in Pallas)
# ----------------------------------------------------------------------------

def _extract_patches(x_nhwc, kh, kw, stride, pad, pad_value=0.0):
    B, H, W, C = x_nhwc.shape
    Ho = (H + 2 * pad - kh) // stride + 1
    Wo = (W + 2 * pad - kw) // stride + 1
    if pad > 0:
        x_nhwc = jnp.pad(
            x_nhwc, ((0, 0), (pad, pad), (pad, pad), (0, 0)),
            constant_values=pad_value)
    cols = []
    for dh in range(kh):
        for dw in range(kw):
            cols.append(
                x_nhwc[:,
                       dh:dh + (Ho - 1) * stride + 1:stride,
                       dw:dw + (Wo - 1) * stride + 1:stride, :])
    return cols, Ho, Wo


def conv2d_bn(x_nhwc, w, bias, stride, pad, relu=True, residual=None):
    """Conv (weights with BN scale folded in) + bias (+residual) (+ReLU).

    w layout: (kh, kw, cin, cout). Returns NHWC bf16.
    """
    kh, kw, cin, cout = w.shape
    B = x_nhwc.shape[0]
    cols, Ho, Wo = _extract_patches(x_nhwc, kh, kw, stride, pad, 0.0)
    patches = cols[0] if (kh == 1 and kw == 1) else jnp.concatenate(cols, axis=-1)
    a = patches.reshape(B * Ho * Wo, kh * kw * cin)
    wmat = w.reshape(kh * kw * cin, cout)
    res2 = None if residual is None else residual.reshape(B * Ho * Wo, cout)
    out = fused_matmul_bn(a, wmat, bias, residual=res2, relu=relu)
    return out.reshape(B, Ho, Wo, cout)


def maxpool_3x3_s2_p1(x_nhwc):
    B, H, W, C = x_nhwc.shape
    cols, Ho, Wo = _extract_patches(x_nhwc, 3, 3, 2, 1, pad_value=-jnp.inf)
    M = B * Ho * Wo
    # Lane-dense repack for narrow channel counts (e.g. C=64 -> (M/2, 128)).
    if C < 128 and (M * C) % 128 == 0:
        Cd = 128
        Md = (M * C) // 128
    else:
        Cd, Md = C, M
    slabs = [c.reshape(Md, Cd) for c in cols]
    tm = _choose_row_tile(Md)
    out = pl.pallas_call(
        _maxpool9_kernel,
        out_shape=jax.ShapeDtypeStruct((Md, Cd), x_nhwc.dtype),
        grid=(Md // tm,),
        in_specs=[pl.BlockSpec((tm, Cd), lambda i: (i, 0)) for _ in range(9)],
        out_specs=pl.BlockSpec((tm, Cd), lambda i: (i, 0)),
        compiler_params=pltpu.CompilerParams(dimension_semantics=("parallel",)),
    )(*slabs)
    return out.reshape(B, Ho, Wo, C)


def global_avg_pool(x_nhwc):
    B, H, W, C = x_nhwc.shape
    x3 = x_nhwc.reshape(B, H * W, C)
    tc = 512 if C % 512 == 0 else (128 if C % 128 == 0 else C)
    return pl.pallas_call(
        _global_avg_kernel,
        out_shape=jax.ShapeDtypeStruct((B, C), jnp.float32),
        grid=(C // tc,),
        in_specs=[pl.BlockSpec((B, H * W, tc), lambda i: (0, 0, i))],
        out_specs=pl.BlockSpec((B, tc), lambda i: (0, i)),
        compiler_params=pltpu.CompilerParams(dimension_semantics=("parallel",)),
    )(x3)


# ----------------------------------------------------------------------------
# Deterministic parameter construction (ResNet-50 shapes, synthetic values)
# BN scale is folded into the conv weight here; only the bias is kept.
# ----------------------------------------------------------------------------

class _KeyGen:
    def __init__(self, key):
        self._key = key

    def __call__(self):
        self._key, sub = jax.random.split(self._key)
        return sub


def _conv_init(key, kh, kw, cin, cout):
    fan_in = kh * kw * cin
    return (jax.random.normal(key, (kh, kw, cin, cout), jnp.float32)
            * jnp.sqrt(2.0 / fan_in))


def _bn_init(key, c):
    k1, k2 = jax.random.split(key)
    scale = jax.random.uniform(k1, (1, c), jnp.float32, 0.9, 1.1)
    bias = jax.random.normal(k2, (1, c), jnp.float32) * 0.01
    return scale, bias


def _conv_bn_init(kg, kh, kw, cin, cout):
    w = _conv_init(kg(), kh, kw, cin, cout)
    scale, bias = _bn_init(kg(), cout)
    w = w * scale.reshape(1, 1, 1, cout)          # fold BN scale into weights
    return w, bias


def _make_bottleneck(kg, inplanes, planes, stride, downsample):
    w1, b1 = _conv_bn_init(kg, 1, 1, inplanes, planes)
    w2, b2 = _conv_bn_init(kg, 3, 3, planes, planes)
    w3, b3 = _conv_bn_init(kg, 1, 1, planes, planes * 4)
    p = {"w1": w1, "b1": b1, "w2": w2, "b2": b2, "w3": w3, "b3": b3,
         "stride": stride}
    if downsample:
        wd, bd = _conv_bn_init(kg, 1, 1, inplanes, planes * 4)
        p["wd"], p["bd"] = wd, bd
    return p


def init_resnet50_params(key):
    kg = _KeyGen(key)
    # conv1: 7x7, 1 -> 64, stride 2, pad 3 (the "mean over RGB" grayscale conv)
    w1, b1 = _conv_bn_init(kg, 7, 7, 1, 64)
    params = {"conv1_w": w1, "conv1_b": b1}
    layer_cfg = [("layer1", 64, 3, 1),
                 ("layer2", 128, 4, 2),
                 ("layer3", 256, 6, 2),
                 ("layer4", 512, 3, 2)]
    inplanes = 64
    for name, planes, blocks, stride in layer_cfg:
        layer = [_make_bottleneck(kg, inplanes, planes, stride, downsample=True)]
        inplanes = planes * 4
        for _ in range(blocks - 1):
            layer.append(_make_bottleneck(kg, inplanes, planes, 1,
                                          downsample=False))
        params[name] = layer
    return params


# ----------------------------------------------------------------------------
# Forward pass
# ----------------------------------------------------------------------------

def _bottleneck_forward(x, p):
    out = conv2d_bn(x, p["w1"], p["b1"], stride=1, pad=0, relu=True)
    out = conv2d_bn(out, p["w2"], p["b2"], stride=p["stride"], pad=1, relu=True)
    if "wd" in p:
        identity = conv2d_bn(x, p["wd"], p["bd"], stride=p["stride"], pad=0,
                             relu=False)
    else:
        identity = x
    # conv3 + BN3 + residual add + ReLU, all fused in one kernel.
    return conv2d_bn(out, p["w3"], p["b3"], stride=1, pad=0, relu=True,
                     residual=identity)


def resnet50_backbone_forward(params, x_nchw):
    """x_nchw: (B, 1, H, W) f32  ->  (B, 2048) f32 (== torch.flatten(avgpool, 1))."""
    x = jnp.transpose(x_nchw, (0, 2, 3, 1)).astype(jnp.bfloat16)   # NCHW -> NHWC
    x = conv2d_bn(x, params["conv1_w"], params["conv1_b"], stride=2, pad=3,
                  relu=True)
    x = maxpool_3x3_s2_p1(x)
    for layer_name in ("layer1", "layer2", "layer3", "layer4"):
        for block in params[layer_name]:
            x = _bottleneck_forward(x, block)
    return global_avg_pool(x)                                      # (B, 2048) f32


# ----------------------------------------------------------------------------
# Main
# ----------------------------------------------------------------------------

if __name__ == "__main__":
    root = jax.random.PRNGKey(0)
    k_in, k_par = jax.random.split(root)

    # Small but downsample-compatible input: 64x64 -> 2x2 before the global pool.
    x = jax.random.normal(k_in, (2, 1, 64, 64), jnp.float32)
    params = init_resnet50_params(k_par)

    out = resnet50_backbone_forward(params, x)
    out = jax.block_until_ready(out)

    assert out.shape == (2, 2048), out.shape
    assert out.dtype == jnp.float32
    assert bool(jnp.all(jnp.isfinite(out)))
    print("KERNEL_OK")
</pallas_src>

<mosaic_0001>
module attributes {stable_mosaic.version = 11 : i64} {
  func.func @_fused_matmul_kernel(%arg0: i32, %arg1: i32, %arg2: i32, %arg3: memref<512x49xbf16, #tpu.memory_space<vmem>>, %arg4: memref<49x64xbf16, #tpu.memory_space<vmem>>, %arg5: memref<1x64xf32, #tpu.memory_space<vmem>>, %arg6: memref<512x64xbf16, #tpu.memory_space<vmem>>, %arg7: memref<512x64xf32, #tpu.memory_space<vmem>>) attributes {dimension_semantics = [#tpu.dimension_semantics<parallel>, #tpu.dimension_semantics<parallel>, #tpu.dimension_semantics<arbitrary>], iteration_bounds = array<i64: 4, 1, 1>, scalar_prefetch = 0 : i64, scratch_operands = 1 : i64, tpu.core_type = #tpu.core_type<tc>, window_params = [{transform_indices = @transform_0, window_bounds = array<i64: 512, 49>}, {transform_indices = @transform_1, window_bounds = array<i64: 49, 64>}, {transform_indices = @transform_2, window_bounds = array<i64: 1, 64>}, {transform_indices = @transform_3, window_bounds = array<i64: 512, 64>}]} {
    %c0_i32 = arith.constant 0 : i32
    %0 = arith.cmpi eq, %arg2, %c0_i32 : i32
    %1 = arith.extui %0 : i1 to i32
    %c0_i32_0 = arith.constant 0 : i32
    %2 = arith.cmpi ne, %1, %c0_i32_0 : i32
    scf.if %2 {
      %cst_10 = arith.constant 0.000000e+00 : f32
      %12 = vector.broadcast %cst_10 : f32 to vector<512x64xf32>
      %c0_11 = arith.constant 0 : index
      %c0_12 = arith.constant 0 : index
      %13 = vector.load %arg7[%c0_11, %c0_12] : memref<512x64xf32, #tpu.memory_space<vmem>>, vector<512x64xf32>
      tpu.vector_store %arg7[%c0_11, %c0_12], %12 {strides = array<i32>} : memref<512x64xf32, #tpu.memory_space<vmem>>, vector<512x64xf32>,
    } else {
    }
    %c0 = arith.constant 0 : index
    %c0_1 = arith.constant 0 : index
    %3 = vector.load %arg7[%c0, %c0_1] : memref<512x64xf32, #tpu.memory_space<vmem>>, vector<512x64xf32>
    %c0_2 = arith.constant 0 : index
    %c0_3 = arith.constant 0 : index
    %4 = vector.load %arg3[%c0_2, %c0_3] : memref<512x49xbf16, #tpu.memory_space<vmem>>, vector<512x49xbf16>
    %c0_4 = arith.constant 0 : index
    %c0_5 = arith.constant 0 : index
    %5 = vector.load %arg4[%c0_4, %c0_5] : memref<49x64xbf16, #tpu.memory_space<vmem>>, vector<49x64xbf16>
    %cst = arith.constant dense<0.000000e+00> : vector<512x64xf32>
    %6 = tpu.matmul %4, %5, %cst {dimension_numbers = #tpu.dot_dimension_numbers<[1], [0], [0], [1], [0, 0, 1, 1], [], []>} : vector<512x49xbf16>, vector<49x64xbf16>, vector<512x64xf32> -> vector<512x64xf32>
    %7 = arith.addf %3, %6 : vector<512x64xf32>
    %c0_6 = arith.constant 0 : index
    %c0_7 = arith.constant 0 : index
    %8 = vector.load %arg7[%c0_6, %c0_7] : memref<512x64xf32, #tpu.memory_space<vmem>>, vector<512x64xf32>
    tpu.vector_store %arg7[%c0_6, %c0_7], %7 {strides = array<i32>} : memref<512x64xf32, #tpu.memory_space<vmem>>, vector<512x64xf32>,
    %c0_i32_8 = arith.constant 0 : i32
    %9 = arith.cmpi eq, %arg2, %c0_i32_8 : i32
    %10 = arith.extui %9 : i1 to i32
    %c0_i32_9 = arith.constant 0 : i32
    %11 = arith.cmpi ne, %10, %c0_i32_9 : i32
    scf.if %11 {
      %c0_10 = arith.constant 0 : index
      %c0_11 = arith.constant 0 : index
      %12 = vector.load %arg7[%c0_10, %c0_11] : memref<512x64xf32, #tpu.memory_space<vmem>>, vector<512x64xf32>
      %c0_12 = arith.constant 0 : index
      %c0_13 = arith.constant 0 : index
      %13 = vector.load %arg5[%c0_12, %c0_13] : memref<1x64xf32, #tpu.memory_space<vmem>>, vector<1x64xf32>
      %14 = vector.broadcast %13 : vector<1x64xf32> to vector<512x64xf32>
      %15 = arith.addf %12, %14 : vector<512x64xf32>
      %cst_14 = arith.constant 0.000000e+00 : f32
      %16 = vector.broadcast %cst_14 : f32 to vector<512x64xf32>
      %17 = arith.maximumf %15, %16 : vector<512x64xf32>
      %18 = arith.truncf %17 : vector<512x64xf32> to vector<512x64xbf16>
      %c0_15 = arith.constant 0 : index
      %c0_16 = arith.constant 0 : index
      %19 = vector.load %arg6[%c0_15, %c0_16] : memref<512x64xbf16, #tpu.memory_space<vmem>>, vector<512x64xbf16>
      tpu.vector_store %arg6[%c0_15, %c0_16], %18 {strides = array<i32>} : memref<512x64xbf16, #tpu.memory_space<vmem>>, vector<512x64xbf16>,
    } else {
    }
    return
  }
  func.func @transform_0(%arg0: i32, %arg1: i32, %arg2: i32) -> (i32, i32) {
    %c0_i32 = arith.constant 0 : i32
    return %arg0, %arg2 : i32, i32
  }
  func.func @transform_1(%arg0: i32, %arg1: i32, %arg2: i32) -> (i32, i32) {
    %c0_i32 = arith.constant 0 : i32
    return %arg2, %arg1 : i32, i32
  }
  func.func @transform_2(%arg0: i32, %arg1: i32, %arg2: i32) -> (i32, i32) {
    %c0_i32 = arith.constant 0 : i32
    %c0_i32_0 = arith.constant 0 : i32
    return %c0_i32, %arg1 : i32, i32
  }
  func.func @transform_3(%arg0: i32, %arg1: i32, %arg2: i32) -> (i32, i32) {
    %c0_i32 = arith.constant 0 : i32
    return %arg0, %arg1 : i32, i32
  }
}

</mosaic_0001>

<bundles_post_ra>
// kernel: tpu_custom_call.1
= control target key start
LH: loop header
LB: loop body
LE: loop exit
PB: predicated region body
PF: predicated region fallthrough
CT: control target
= control target key end

     0   :  { %s1791_s12 = smov 0   ;;  %s1793_s13 = smov 0   ;;  %s2328_s0 = inlined_call_operand.vmem [shape: bf16[2048,49], index: 0, kind: input, shape index: {}]   ;;  %s2329_s1 = inlined_call_operand.vmem [shape: bf16[49,64], index: 1, kind: input, shape index: {}]   ;;  %s2330_s2 = inlined_call_operand.vmem [shape: f32[1,64], index: 2, kind: input, shape index: {}]   ;;  %s2331_s3 = inlined_call_operand.vmem [shape: bf16[2048,64], index: 3, kind: output, shape index: {}]  }
   0x1   :  { %s1795_s14 = smov 0  }
   0x2 LB: > { %s32_s15 = sadd.s32 1, %s1763_s13  ;;  %p1491_p0 = scmp.ge.s32.totalorder %s1767_s14, 1  ;;  %s1767_s14 = sphi %s1795_s14, %s13_s14   ;;  %s1763_s13 = sphi %s1793_s13, %s2333_s13   ;;  %s1759_s12 = sphi %s1791_s12, %s2332_s12  }
   0x3   : > { %p34_p1 = scmp.ge.s32.totalorder %s32_s15, 4  ;;  %p188_p2 = scmp.lt.s32.totalorder %s1767_s14, 5 }
   0x5   : > { %s2335_s15 = smov (%p34_p1, %s32_s15), 0  ;;  %p189_p3 = pnand %p1491_p0, %p188_p2 }
   0x6   : > { %s1492_s18 = sshll.u32 (!%p189_p3), %s1759_s12, 6 }
   0x7   : > { %192 = sbr.rel (%p189_p3) target bundleno = 311 (0x137), region = 32  ;;  %p230_p4 = scmp.lt.s32.totalorder (!%p189_p3), %s1492_s18, 255 }
   0xc   : > { %v463_v0 = vld [vmem:[%s2329_s1 + $0x18] sm:$0x1]  ;;  %vm742_vm0 = vcmask 1040384   ;;  %v1769_v2 = vmov 0   ;;  %v1704_v6 = vld [vmem:[%s2329_s1 + $0x10] sm:$0xff]  ;;  %s2337_s18 = smov (!%p230_p4, %s1492_s18), 255 }
   0xd   : > { %v637_v1 = vunpack.c.l.b16 %v463_v0  ;;  %v744_v3 = vsel %vm742_vm0, 65535, %v1769_v2  ;;  %v1703_v7 = vld [vmem:[%s2329_s1 + $0x8] sm:$0xff]  ;;  %s1493_s23 = sshll.u32 %s2337_s18, 2  ;;  %v1702_v8 = vld [vmem:[%s2329_s1] sm:$0xff]  ;;  %vm645_vm1 = vcmask 400384   ;;  %vm264_vm2 = vcmask 523264  }
   0xe   : > { %s1829_s28 = scalar_lea.vmem %s2328_s0, %s1493_s23  ;;  %v1770_v33 = vmov 0.0   ;;  %v1997_v46 = vld [vmem:[%s2330_s2] ss:$0 sm:$0xff]  ;;  %s2019_s6 = scalar_lea.vmem %s2331_s3, %s1493_s23  ;;  %vm1309_vm3 = vcmask 519168  }
   0xf   : > { %v641_v4 = vpack.c.b16 %v637_v1, %v637_v1  ;;  %v1670_v9 = vld [vmem:[%s1829_s28] sm:$0xff]  ;;  %v1671_v13 = vld [vmem:[%s1829_s28 + $0x8] sm:$0xff]  ;;  %v1672_v17 = vld [vmem:[%s1829_s28 + $0x10] sm:$0xff]  ;;  %265 = vst.msk [vmem:[#allocation2] sm:$0xff] %vm264_vm2, %v1770_v33 }
  0x10   : > { %v1678_v10 = vld [vmem:[%s1829_s28 + $0x40] sm:$0xff]  ;;  %v1679_v14 = vld [vmem:[%s1829_s28 + $0x48] sm:$0xff]  ;;  %v1680_v18 = vld [vmem:[%s1829_s28 + $0x50] sm:$0xff]  ;;  %266 = vst.msk [vmem:[#allocation2 + $0x8] sm:$0xff] %vm264_vm2, %v1770_v33 }
  0x11   : > { %v746_v5 = vand.u32 %v744_v3, %v641_v4  ;;  %v1686_v11 = vld [vmem:[%s1829_s28 + $0x80] sm:$0xff]  ;;  %v1687_v15 = vld [vmem:[%s1829_s28 + $0x88] sm:$0xff]  ;;  %v1688_v19 = vld [vmem:[%s1829_s28 + $0x90] sm:$0xff]  ;;  %267 = vst.msk [vmem:[#allocation2 + $0x10] sm:$0xff] %vm264_vm2, %v1770_v33 }
  0x12   : > { %v1694_v12 = vld [vmem:[%s1829_s28 + $0xc0] sm:$0xff]  ;;  %v1695_v16 = vld [vmem:[%s1829_s28 + $0xc8] sm:$0xff]  ;;  %v1696_v20 = vld [vmem:[%s1829_s28 + $0xd0] sm:$0xff]  ;;  %268 = vst.msk [vmem:[#allocation2 + $0x18] sm:$0xff] %vm264_vm2, %v1770_v33 }
  0x13   : > { %752 = vmatpush.bf16.msra.mxu0 %v746_v5  ;;  %1705 = vmatpush.bf16.msra.mxu1 %v746_v5  ;;  %v1673_v21 = vld [vmem:[%s1829_s28 + $0x18] sm:$0xff]  ;;  %v1674_v25 = vld [vmem:[%s1829_s28 + $0x20] sm:$0xff]  ;;  %v1675_v29 = vld [vmem:[%s1829_s28 + $0x28] sm:$0xff]  ;;  %269 = vst.msk [vmem:[#allocation2 + $0x20] sm:$0xff] %vm264_vm2, %v1770_v33 }
  0x14   : > { %1706 = vmatpush.bf16.msra.mxu2 %v746_v5  ;;  %1707 = vmatpush.bf16.msra.mxu3 %v746_v5  ;;  %v1681_v22 = vld [vmem:[%s1829_s28 + $0x58] sm:$0xff]  ;;  %v1682_v26 = vld [vmem:[%s1829_s28 + $0x60] sm:$0xff]  ;;  %v1683_v30 = vld [vmem:[%s1829_s28 + $0x68] sm:$0xff]  ;;  %270 = vst.msk [vmem:[#allocation2 + $0x28] sm:$0xff] %vm264_vm2, %v1770_v33 }
  0x15   : > { %v1689_v23 = vld [vmem:[%s1829_s28 + $0x98] sm:$0xff]  ;;  %v1690_v27 = vld [vmem:[%s1829_s28 + $0xa0] sm:$0xff]  ;;  %v1691_v31 = vld [vmem:[%s1829_s28 + $0xa8] sm:$0xff]  ;;  %271 = vst.msk [vmem:[#allocation2 + $0x30] sm:$0xff] %vm264_vm2, %v1770_v33 }
  0x16   : > { %v1697_v24 = vld [vmem:[%s1829_s28 + $0xd8] sm:$0xff]  ;;  %v1698_v28 = vld [vmem:[%s1829_s28 + $0xe0] sm:$0xff]  ;;  %v1699_v32 = vld [vmem:[%s1829_s28 + $0xe8] sm:$0xff]  ;;  %272 = vst.msk [vmem:[#allocation2 + $0x38] sm:$0xff] %vm264_vm2, %v1770_v33 }
  0x17   : > { %753 = vmatpush.bf16.msra.mxu0 %v1704_v6  ;;  %1708 = vmatpush.bf16.msra.mxu1 %v1704_v6  ;;  %273 = vst.msk [vmem:[#allocation2 + $0x40] sm:$0xff] %vm264_vm2, %v1770_v33  ;;  %v1676_v34 = vld [vmem:[%s1829_s28 + $0x30] sm:$0xff]  ;;  %v1677_v38 = vld [vmem:[%s1829_s28 + $0x38] sm:$0xff]  ;;  %v329_v42 = vld [vmem:[#allocation2] sm:$0xff] }
  0x18   : > { %1709 = vmatpush.bf16.msra.mxu2 %v1704_v6  ;;  %1710 = vmatpush.bf16.msra.mxu3 %v1704_v6  ;;  %274 = vst.msk [vmem:[#allocation2 + $0x48] sm:$0xff] %vm264_vm2, %v1770_v33  ;;  %v1684_v35 = vld [vmem:[%s1829_s28 + $0x70] sm:$0xff]  ;;  %v1685_v39 = vld [vmem:[%s1829_s28 + $0x78] sm:$0xff]  ;;  %v330_v63 = vld [vmem:[#allocation2 + $0x8] sm:$0xff] }
  0x19   : > { %275 = vst.msk [vmem:[#allocation2 + $0x50] sm:$0xff] %vm264_vm2, %v1770_v33  ;;  %v1692_v36 = vld [vmem:[%s1829_s28 + $0xb0] sm:$0xff]  ;;  %v1693_v40 = vld [vmem:[%s1829_s28 + $0xb8] sm:$0xff] }
  0x1a   : > { %v1700_v37 = vld [vmem:[%s1829_s28 + $0xf0] sm:$0xff]  ;;  %276 = vst.msk [vmem:[#allocation2 + $0x58] sm:$0xff] %vm264_vm2, %v1770_v33  ;;  %v1701_v41 = vld [vmem:[%s1829_s28 + $0xf8] sm:$0xff] }
  0x1b   : > { %754 = vmatpush.bf16.msra.mxu0 %v1703_v7  ;;  %1711 = vmatpush.bf16.msra.mxu1 %v1703_v7  ;;  %277 = vst.msk [vmem:[#allocation2 + $0x60] sm:$0xff] %vm264_vm2, %v1770_v33 }
  0x1c   : > { %1712 = vmatpush.bf16.msra.mxu2 %v1703_v7  ;;  %1713 = vmatpush.bf16.msra.mxu3 %v1703_v7  ;;  %278 = vst.msk [vmem:[#allocation2 + $0x68] sm:$0xff] %vm264_vm2, %v1770_v33  ;;  %v331_v7 = vld [vmem:[#allocation2 + $0x10] sm:$0xff] }
  0x1d   : > { %279 = vst.msk [vmem:[#allocation2 + $0x70] sm:$0xff] %vm264_vm2, %v1770_v33 }
  0x1e   : > { %280 = vst.msk [vmem:[#allocation2 + $0x78] sm:$0xff] %vm264_vm2, %v1770_v33 }
  0x1f   : > { %755 = vmatpush.bf16.msra.mxu0 %v1702_v8  ;;  %1714 = vmatpush.bf16.msra.mxu1 %v1702_v8  ;;  %281 = vst.msk [vmem:[#allocation2 + $0x80] sm:$0xff] %vm264_vm2, %v1770_v33 }
  0x20   : > { %1715 = vmatpush.bf16.msra.mxu2 %v1702_v8  ;;  %1716 = vmatpush.bf16.msra.mxu3 %v1702_v8  ;;  %282 = vst.msk [vmem:[#allocation2 + $0x88] sm:$0xff] %vm264_vm2, %v1770_v33 }
  0x21   : > { %283 = vst.msk [vmem:[#allocation2 + $0x90] sm:$0xff] %vm264_vm2, %v1770_v33 }
  0x22   : > { %1636 = vmatmul.msk.bf16.vlgmr.msra.gmra.mxu0 %vm645_vm1, %v1670_v9  ;;  %1644 = vmatmul.msk.bf16.vlgmr.msra.gmra.mxu1 %vm645_vm1, %v1678_v10  ;;  %284 = vst.msk [vmem:[#allocation2 + $0x98] sm:$0xff] %vm264_vm2, %v1770_v33 }
  0x23   : > { %1652 = vmatmul.msk.bf16.vlgmr.msra.gmra.mxu2 %vm645_vm1, %v1686_v11  ;;  %1660 = vmatmul.msk.bf16.vlgmr.msra.gmra.mxu3 %vm645_vm1, %v1694_v12  ;;  %285 = vst.msk [vmem:[#allocation2 + $0xa0] sm:$0xff] %vm264_vm2, %v1770_v33 }
  0x24   : > { %286 = vst.msk [vmem:[#allocation2 + $0xa8] sm:$0xff] %vm264_vm2, %v1770_v33 }
  0x25   : > { %287 = vst.msk [vmem:[#allocation2 + $0xb0] sm:$0xff] %vm264_vm2, %v1770_v33 }
  0x26   : > { %288 = vst.msk [vmem:[#allocation2 + $0xb8] sm:$0xff] %vm264_vm2, %v1770_v33  ;;  %v345_v57 = vld [vmem:[#allocation2 + $0x80] sm:$0xff] }
  0x27   : > { %289 = vst.msk [vmem:[#allocation2 + $0xc0] sm:$0xff] %vm264_vm2, %v1770_v33  ;;  %v346_v1 = vld [vmem:[#allocation2 + $0x88] sm:$0xff] }
  0x28   : > { %290 = vst.msk [vmem:[#allocation2 + $0xc8] sm:$0xff] %vm264_vm2, %v1770_v33  ;;  %v347_v11 = vld [vmem:[#allocation2 + $0x90] sm:$0xff] }
  0x29   : > { %291 = vst.msk [vmem:[#allocation2 + $0xd0] sm:$0xff] %vm264_vm2, %v1770_v33 }
  0x2a   : > { %292 = vst.msk [vmem:[#allocation2 + $0xd8] sm:$0xff] %vm264_vm2, %v1770_v33 }
  0x2b   : > { %293 = vst.msk [vmem:[#allocation2 + $0xe0] sm:$0xff] %vm264_vm2, %v1770_v33 }
  0x2c   : > { %294 = vst.msk [vmem:[#allocation2 + $0xe8] sm:$0xff] %vm264_vm2, %v1770_v33 }
  0x2d   : > { %295 = vst.msk [vmem:[#allocation2 + $0xf0] sm:$0xff] %vm264_vm2, %v1770_v33 }
  0x2e   : > { %296 = vst.msk [vmem:[#allocation2 + $0xf8] sm:$0xff] %vm264_vm2, %v1770_v33 }
  0x2f   : > { %297 = vst.msk [vmem:[#allocation2 + $0x100] sm:$0xff] %vm264_vm2, %v1770_v33 }
  0x30   : > { %298 = vst.msk [vmem:[#allocation2 + $0x108] sm:$0xff] %vm264_vm2, %v1770_v33 }
  0x31   : > { %299 = vst.msk [vmem:[#allocation2 + $0x110] sm:$0xff] %vm264_vm2, %v1770_v33 }
  0x32   : > { %1637 = vmatmul.msk.bf16.gmra.mxu0 %vm645_vm1, %v1671_v13  ;;  %1645 = vmatmul.msk.bf16.gmra.mxu1 %vm645_vm1, %v1679_v14  ;;  %300 = vst.msk [vmem:[#allocation2 + $0x118] sm:$0xff] %vm264_vm2, %v1770_v33 }
  0x33   : > { %1653 = vmatmul.msk.bf16.gmra.mxu2 %vm645_vm1, %v1687_v15  ;;  %1661 = vmatmul.msk.bf16.gmra.mxu3 %vm645_vm1, %v1695_v16  ;;  %301 = vst.msk [vmem:[#allocation2 + $0x120] sm:$0xff] %vm264_vm2, %v1770_v33 }
  0x34   : > { %302 = vst.msk [vmem:[#allocation2 + $0x128] sm:$0xff] %vm264_vm2, %v1770_v33 }
  0x35   : > { %303 = vst.msk [vmem:[#allocation2 + $0x130] sm:$0xff] %vm264_vm2, %v1770_v33 }
  0x36   : > { %304 = vst.msk [vmem:[#allocation2 + $0x138] sm:$0xff] %vm264_vm2, %v1770_v33  ;;  %v361_v60 = vld [vmem:[#allocation2 + $0x100] sm:$0xff] }
  0x37   : > { %305 = vst.msk [vmem:[#allocation2 + $0x140] sm:$0xff] %vm264_vm2, %v1770_v33  ;;  %v362_v3 = vld [vmem:[#allocation2 + $0x108] sm:$0xff] }
  0x38   : > { %306 = vst.msk [vmem:[#allocation2 + $0x148] sm:$0xff] %vm264_vm2, %v1770_v33  ;;  %v363_v15 = vld [vmem:[#allocation2 + $0x110] sm:$0xff] }
  0x39   : > { %307 = vst.msk [vmem:[#allocation2 + $0x150] sm:$0xff] %vm264_vm2, %v1770_v33 }
  0x3a   : > { %308 = vst.msk [vmem:[#allocation2 + $0x158] sm:$0xff] %vm264_vm2, %v1770_v33 }
  0x3b   : > { %309 = vst.msk [vmem:[#allocation2 + $0x160] sm:$0xff] %vm264_vm2, %v1770_v33 }
  0x3c   : > { %310 = vst.msk [vmem:[#allocation2 + $0x168] sm:$0xff] %vm264_vm2, %v1770_v33 }
  0x3d   : > { %311 = vst.msk [vmem:[#allocation2 + $0x170] sm:$0xff] %vm264_vm2, %v1770_v33 }
  0x3e   : > { %312 = vst.msk [vmem:[#allocation2 + $0x178] sm:$0xff] %vm264_vm2, %v1770_v33 }
  0x3f   : > { %313 = vst.msk [vmem:[#allocation2 + $0x180] sm:$0xff] %vm264_vm2, %v1770_v33 }
  0x40   : > { %314 = vst.msk [vmem:[#allocation2 + $0x188] sm:$0xff] %vm264_vm2, %v1770_v33 }
  0x41   : > { %315 = vst.msk [vmem:[#allocation2 + $0x190] sm:$0xff] %vm264_vm2, %v1770_v33 }
  0x42   : > { %1638 = vmatmul.msk.bf16.gmra.mxu0 %vm645_vm1, %v1672_v17  ;;  %1646 = vmatmul.msk.bf16.gmra.mxu1 %vm645_vm1, %v1680_v18  ;;  %316 = vst.msk [vmem:[#allocation2 + $0x198] sm:$0xff] %vm264_vm2, %v1770_v33 }
  0x43   : > { %1654 = vmatmul.msk.bf16.gmra.mxu2 %vm645_vm1, %v1688_v19  ;;  %1662 = vmatmul.msk.bf16.gmra.mxu3 %vm645_vm1, %v1696_v20  ;;  %317 = vst.msk [vmem:[#allocation2 + $0x1a0] sm:$0xff] %vm264_vm2, %v1770_v33  ;;  %v332_v19 = vld [vmem:[#allocation2 + $0x18] sm:$0xff] }
  0x44   : > { %318 = vst.msk [vmem:[#allocation2 + $0x1a8] sm:$0xff] %vm264_vm2, %v1770_v33 }
  0x45   : > { %319 = vst.msk [vmem:[#allocation2 + $0x1b0] sm:$0xff] %vm264_vm2, %v1770_v33 }
  0x46   : > { %320 = vst.msk [vmem:[#allocation2 + $0x1b8] sm:$0xff] %vm264_vm2, %v1770_v33  ;;  %v377_v61 = vld [vmem:[#allocation2 + $0x180] sm:$0xff] }
  0x47   : > { %321 = vst.msk [vmem:[#allocation2 + $0x1c0] sm:$0xff] %vm264_vm2, %v1770_v33  ;;  %v378_v5 = vld [vmem:[#allocation2 + $0x188] sm:$0xff] }
  0x48   : > { %322 = vst.msk [vmem:[#allocation2 + $0x1c8] sm:$0xff] %vm264_vm2, %v1770_v33  ;;  %v379_v17 = vld [vmem:[#allocation2 + $0x190] sm:$0xff] }
  0x49   : > { %323 = vst.msk [vmem:[#allocation2 + $0x1d0] sm:$0xff] %vm264_vm2, %v1770_v33 }
  0x4a   : > { %324 = vst.msk [vmem:[#allocation2 + $0x1d8] sm:$0xff] %vm264_vm2, %v1770_v33 }
  0x4b   : > { %325 = vst.msk [vmem:[#allocation2 + $0x1e0] sm:$0xff] %vm264_vm2, %v1770_v33 }
  0x4c   : > { %326 = vst.msk [vmem:[#allocation2 + $0x1e8] sm:$0xff] %vm264_vm2, %v1770_v33 }
  0x4d   : > { %327 = vst.msk [vmem:[#allocation2 + $0x1f0] sm:$0xff] %vm264_vm2, %v1770_v33 }
  0x4e   : > { %328 = vst.msk [vmem:[#allocation2 + $0x1f8] sm:$0xff] %vm264_vm2, %v1770_v33 }
  0x52   : > { %1639 = vmatmul.msk.bf16.gmra.mxu0 %vm645_vm1, %v1673_v21  ;;  %1647 = vmatmul.msk.bf16.gmra.mxu1 %vm645_vm1, %v1681_v22  ;;  %v348_v21 = vld [vmem:[#allocation2 + $0x98] sm:$0xff] }
  0x53   : > { %1655 = vmatmul.msk.bf16.gmra.mxu2 %vm645_vm1, %v1689_v23  ;;  %1663 = vmatmul.msk.bf16.gmra.mxu3 %vm645_vm1, %v1697_v24  ;;  %v364_v23 = vld [vmem:[#allocation2 + $0x118] sm:$0xff] }
  0x62   : > { %1640 = vmatmul.msk.bf16.gmra.mxu0 %vm645_vm1, %v1674_v25  ;;  %1648 = vmatmul.msk.bf16.gmra.mxu1 %vm645_vm1, %v1682_v26 }
  0x63   : > { %1656 = vmatmul.msk.bf16.gmra.mxu2 %vm645_vm1, %v1690_v27  ;;  %1664 = vmatmul.msk.bf16.gmra.mxu3 %vm645_vm1, %v1698_v28 }
  0x72   : > { %1641 = vmatmul.msk.bf16.gmra.mxu0 %vm645_vm1, %v1675_v29  ;;  %1649 = vmatmul.msk.bf16.gmra.mxu1 %vm645_vm1, %v1683_v30 }
  0x73   : > { %1657 = vmatmul.msk.bf16.gmra.mxu2 %vm645_vm1, %v1691_v31  ;;  %1665 = vmatmul.msk.bf16.gmra.mxu3 %vm645_vm1, %v1699_v32 }
  0x82   : > { %1642 = vmatmul.msk.bf16.gmra.mxu0 %vm645_vm1, %v1676_v34  ;;  %1650 = vmatmul.msk.bf16.gmra.mxu1 %vm645_vm1, %v1684_v35 }
  0x83   : > { %1658 = vmatmul.msk.bf16.gmra.mxu2 %vm645_vm1, %v1692_v36  ;;  %1666 = vmatmul.msk.bf16.gmra.mxu3 %vm645_vm1, %v1700_v37 }
  0x92   : > { %1643 = vmatmul.msk.bf16.gmra.mxu0 %vm645_vm1, %v1677_v38  ;;  %1651 = vmatmul.msk.bf16.gmra.mxu1 %vm645_vm1, %v1685_v39 }
  0x93   : > { %1659 = vmatmul.msk.bf16.gmra.mxu2 %vm645_vm1, %v1693_v40  ;;  %1667 = vmatmul.msk.bf16.gmra.mxu3 %vm645_vm1, %v1701_v41 }
  0x9f   : > { %v757_v43 = vpop.f32.mrf.mxu0  ;;  %v797_v44 = vpop.f32.mrf.mxu1 }
  0xa0   : > { %v917_v45 = vadd.f32 %v757_v43, %v329_v42  ;;  %v933_v62 = vadd.f32 %v797_v44, %v345_v57 }
  0xa2   : > { %982 = vst.msk [vmem:[#allocation2] sm:$0xff] %vm264_vm2, %v917_v45 }
  0xa3   : > { %998 = vst.msk [vmem:[#allocation2 + $0x80] sm:$0xff] %vm264_vm2, %v933_v62 }
  0xa6   : > { %v837_v47 = vpop.f32.mrf.mxu2  ;;  %v877_v48 = vpop.f32.mrf.mxu3 }
  0xa7   : > { %v759_v49 = vpop.f32.mrf.mxu0  ;;  %v799_v50 = vpop.f32.mrf.mxu1  ;;  %v949_v0 = vadd.f32 %v837_v47, %v361_v60  ;;  %v965_v2 = vadd.f32 %v877_v48, %v377_v61 }
  0xa8   : > { %v918_v4 = vadd.f32 %v759_v49, %v330_v63  ;;  %v934_v6 = vadd.f32 %v799_v50, %v346_v1 }
  0xa9   : > { %v1049_v51 = vld [vmem:[#allocation2] sm:$0xff]  ;;  %1014 = vst.msk [vmem:[#allocation2 + $0x100] sm:$0xff] %vm264_vm2, %v949_v0 }
  0xaa   : > { %v1117_v52 = vadd.f32 %v1997_v46, %v1049_v51  ;;  %1030 = vst.msk [vmem:[#allocation2 + $0x180] sm:$0xff] %vm264_vm2, %v965_v2  ;;  %v1065_v24 = vld [vmem:[#allocation2 + $0x80] sm:$0xff] }
  0xab   : > { %983 = vst.msk [vmem:[#allocation2 + $0x8] sm:$0xff] %vm264_vm2, %v918_v4  ;;  %v1133_v26 = vadd.f32 %v1997_v46, %v1065_v24 }
  0xac   : > { %v1181_v53 = vmax.f32 %v1117_v52, 0.0  ;;  %999 = vst.msk [vmem:[#allocation2 + $0x88] sm:$0xff] %vm264_vm2, %v934_v6 }
  0xad   : > { %v1197_v36 = vmax.f32 %v1133_v26, 0.0 }
  0xae   : > { %v1245_v54 = vpack.c.bf16 %v1181_v53, %v1181_v53  ;;  %v839_v55 = vpop.f32.mrf.mxu2  ;;  %v879_v56 = vpop.f32.mrf.mxu3 }
  0xaf   : > { %v762_v58 = vpop.f32.mrf.mxu0  ;;  %v802_v59 = vpop.f32.mrf.mxu1  ;;  %v950_v10 = vadd.f32 %v839_v55, %v362_v3  ;;  %v966_v14 = vadd.f32 %v879_v56, %v378_v5  ;;  %v1261_v42 = vpack.c.bf16 %v1197_v36, %v1197_v36 }
  0xb0   : > { %1310 = vst.msk [vmem:[%s2019_s6] sm:$0xf] %vm1309_vm3, %v1245_v54  ;;  %v919_v16 = vadd.f32 %v762_v58, %v331_v7  ;;  %v935_v18 = vadd.f32 %v802_v59, %v347_v11  ;;  %v1081_v27 = vld [vmem:[#allocation2 + $0x100] sm:$0xff] }
  0xb1   : > { %1015 = vst.msk [vmem:[#allocation2 + $0x108] sm:$0xff] %vm264_vm2, %v950_v10  ;;  %v1149_v31 = vadd.f32 %v1997_v46, %v1081_v27  ;;  %v1097_v32 = vld [vmem:[#allocation2 + $0x180] sm:$0xff] }
  0xb2   : > { %1031 = vst.msk [vmem:[#allocation2 + $0x188] sm:$0xff] %vm264_vm2, %v966_v14  ;;  %v1165_v37 = vadd.f32 %v1997_v46, %v1097_v32  ;;  %v1050_v38 = vld [vmem:[#allocation2 + $0x8] sm:$0xff]  ;;  %v365_v32 = vld [vmem:[#allocation2 + $0x120] sm:$0xff] }
  0xb3   : > { %984 = vst.msk [vmem:[#allocation2 + $0x10] sm:$0xff] %vm264_vm2, %v919_v16  ;;  %v1213_v39 = vmax.f32 %v1149_v31, 0.0  ;;  %v1118_v40 = vadd.f32 %v1997_v46, %v1050_v38  ;;  %v1066_v41 = vld [vmem:[#allocation2 + $0x88] sm:$0xff] }
  0xb4   : > { %1000 = vst.msk [vmem:[#allocation2 + $0x90] sm:$0xff] %vm264_vm2, %v935_v18  ;;  %v1229_v43 = vmax.f32 %v1165_v37, 0.0  ;;  %v1134_v44 = vadd.f32 %v1997_v46, %v1066_v41 }
  0xb5   : > { %v1277_v47 = vpack.c.bf16 %v1213_v39, %v1213_v39  ;;  %v1182_v48 = vmax.f32 %v1118_v40, 0.0  ;;  %1326 = vst.msk [vmem:[%s2019_s6 + $0x40] sm:$0xf] %vm1309_vm3, %v1261_v42  ;;  %v381_v39 = vld [vmem:[#allocation2 + $0x1a0] sm:$0xff] }
  0xb6   : > { %v842_v8 = vpop.f32.mrf.mxu2  ;;  %v882_v9 = vpop.f32.mrf.mxu3  ;;  %v1293_v51 = vpack.c.bf16 %v1229_v43, %v1229_v43  ;;  %v1198_v52 = vmax.f32 %v1134_v44, 0.0  ;;  %v334_v43 = vld [vmem:[#allocation2 + $0x28] sm:$0xff] }
  0xb7   : > { %v764_v12 = vpop.f32.mrf.mxu0  ;;  %v804_v13 = vpop.f32.mrf.mxu1  ;;  %v951_v20 = vadd.f32 %v842_v8, %v363_v15  ;;  %v967_v22 = vadd.f32 %v882_v9, %v379_v17  ;;  %1342 = vst.msk [vmem:[%s2019_s6 + $0x80] sm:$0xf] %vm1309_vm3, %v1277_v47  ;;  %v1246_v55 = vpack.c.bf16 %v1182_v48, %v1182_v48  ;;  %v366_v47 = vld [vmem:[#allocation2 + $0x128] sm:$0xff] }
  0xb8   : > { %v920_v25 = vadd.f32 %v764_v12, %v332_v19  ;;  %v936_v28 = vadd.f32 %v804_v13, %v348_v21  ;;  %v1082_v45 = vld [vmem:[#allocation2 + $0x108] sm:$0xff]  ;;  %1358 = vst.msk [vmem:[%s2019_s6 + $0xc0] sm:$0xf] %vm1309_vm3, %v1293_v51  ;;  %v1262_v59 = vpack.c.bf16 %v1198_v52, %v1198_v52  ;;  %v351_v51 = vld [vmem:[#allocation2 + $0xb0] sm:$0xff] }
  0xb9   : > { %1016 = vst.msk [vmem:[#allocation2 + $0x110] sm:$0xff] %vm264_vm2, %v951_v20  ;;  %v1150_v49 = vadd.f32 %v1997_v46, %v1082_v45  ;;  %v1098_v50 = vld [vmem:[#allocation2 + $0x188] sm:$0xff] }
  0xba   : > { %1032 = vst.msk [vmem:[#allocation2 + $0x190] sm:$0xff] %vm264_vm2, %v967_v22  ;;  %v1166_v53 = vadd.f32 %v1997_v46, %v1098_v50  ;;  %v1051_v54 = vld [vmem:[#allocation2 + $0x10] sm:$0xff]  ;;  %v380_v22 = vld [vmem:[#allocation2 + $0x198] sm:$0xff] }
  0xbb   : > { %985 = vst.msk [vmem:[#allocation2 + $0x18] sm:$0xff] %vm264_vm2, %v920_v25  ;;  %v1214_v56 = vmax.f32 %v1150_v49, 0.0  ;;  %v1119_v57 = vadd.f32 %v1997_v46, %v1051_v54  ;;  %v1067_v58 = vld [vmem:[#allocation2 + $0x90] sm:$0xff]  ;;  %v333_v25 = vld [vmem:[#allocation2 + $0x20] sm:$0xff] }
  0xbc   : > { %1001 = vst.msk [vmem:[#allocation2 + $0x98] sm:$0xff] %vm264_vm2, %v936_v28  ;;  %v1230_v60 = vmax.f32 %v1166_v53, 0.0  ;;  %v1135_v61 = vadd.f32 %v1997_v46, %v1067_v58  ;;  %v349_v28 = vld [vmem:[#allocation2 + $0xa0] sm:$0xff]  ;;  %v335_v50 = vld [vmem:[#allocation2 + $0x30] sm:$0xff] }
  0xbd   : > { %1311 = vst.msk [vmem:[%s2019_s6 + $0x4] sm:$0xf] %vm1309_vm3, %v1246_v55  ;;  %v1278_v1 = vpack.c.bf16 %v1214_v56, %v1214_v56  ;;  %v1183_v2 = vmax.f32 %v1119_v57, 0.0  ;;  %v367_v53 = vld [vmem:[#allocation2 + $0x130] sm:$0xff] }
  0xbe   : > { %v844_v29 = vpop.f32.mrf.mxu2  ;;  %v2049_v30 = vpop.f32.mrf.mxu3  ;;  %1327 = vst.msk [vmem:[%s2019_s6 + $0x44] sm:$0xf] %vm1309_vm3, %v1262_v59  ;;  %v1294_v7 = vpack.c.bf16 %v1230_v60, %v1230_v60  ;;  %v1199_v8 = vmax.f32 %v1135_v61, 0.0  ;;  %v383_v57 = vld [vmem:[#allocation2 + $0x1b0] sm:$0xff]  ;;  %v336_v61 = vld [vmem:[#allocation2 + $0x38] sm:$0xff] }
  0xbf   : > { %v952_v33 = vadd.f32 %v844_v29, %v364_v23  ;;  %v2053_v34 = vpop.f32.mrf.mxu0  ;;  %v2055_v35 = vpop.f32.mrf.mxu1  ;;  %1343 = vst.msk [vmem:[%s2019_s6 + $0x84] sm:$0xf] %vm1309_vm3, %v1278_v1  ;;  %v1247_v11 = vpack.c.bf16 %v1183_v2, %v1183_v2  ;;  %v968_v31 = vadd.f32 %v2049_v30, %v380_v22  ;;  %v350_v30 = vld [vmem:[#allocation2 + $0xa8] sm:$0xff] }
  0xc0   : > { %v1083_v62 = vld [vmem:[#allocation2 + $0x110] sm:$0xff]  ;;  %1359 = vst.msk [vmem:[%s2019_s6 + $0xc4] sm:$0xf] %vm1309_vm3, %v1294_v7  ;;  %v1263_v15 = vpack.c.bf16 %v1199_v8, %v1199_v8  ;;  %v921_v38 = vadd.f32 %v2053_v34, %v333_v25  ;;  %v937_v42 = vadd.f32 %v2055_v35, %v349_v28  ;;  %v382_v34 = vld [vmem:[#allocation2 + $0x1a8] sm:$0xff] }
  0xc1   : > { %1017 = vst.msk [vmem:[#allocation2 + $0x118] sm:$0xff] %vm264_vm2, %v952_v33  ;;  %v1151_v3 = vadd.f32 %v1997_v46, %v1083_v62  ;;  %v1099_v4 = vld [vmem:[#allocation2 + $0x190] sm:$0xff] }
  0xc2   : > { %v1167_v9 = vadd.f32 %v1997_v46, %v1099_v4  ;;  %v1052_v10 = vld [vmem:[#allocation2 + $0x18] sm:$0xff]  ;;  %1312 = vst.msk [vmem:[%s2019_s6 + $0x8] sm:$0xf] %vm1309_vm3, %v1247_v11 }
  0xc3   : > { %v1215_v12 = vmax.f32 %v1151_v3, 0.0  ;;  %v1120_v13 = vadd.f32 %v1997_v46, %v1052_v10  ;;  %v1068_v14 = vld [vmem:[#allocation2 + $0x98] sm:$0xff]  ;;  %1328 = vst.msk [vmem:[%s2019_s6 + $0x48] sm:$0xf] %vm1309_vm3, %v1263_v15 }
  0xc4   : > { %v1231_v16 = vmax.f32 %v1167_v9, 0.0  ;;  %v1136_v17 = vadd.f32 %v1997_v46, %v1068_v14  ;;  %1033 = vst.msk [vmem:[#allocation2 + $0x198] sm:$0xff] %vm264_vm2, %v968_v31 }
  0xc5   : > { %v1279_v19 = vpack.c.bf16 %v1215_v12, %v1215_v12  ;;  %v1184_v20 = vmax.f32 %v1120_v13, 0.0  ;;  %986 = vst.msk [vmem:[#allocation2 + $0x20] sm:$0xff] %vm264_vm2, %v921_v38 }
  0xc6   : > { %v847_v63 = vpop.f32.mrf.mxu2  ;;  %v887_v0 = vpop.f32.mrf.mxu3  ;;  %v1295_v23 = vpack.c.bf16 %v1231_v16, %v1231_v16  ;;  %v1200_v24 = vmax.f32 %v1136_v17, 0.0  ;;  %1002 = vst.msk [vmem:[#allocation2 + $0xa0] sm:$0xff] %vm264_vm2, %v937_v42 }
  0xc7   : > { %v769_v5 = vpop.f32.mrf.mxu0  ;;  %v809_v6 = vpop.f32.mrf.mxu1  ;;  %1344 = vst.msk [vmem:[%s2019_s6 + $0x88] sm:$0xf] %vm1309_vm3, %v1279_v19  ;;  %v1248_v26 = vpack.c.bf16 %v1184_v20, %v1184_v20  ;;  %v953_v44 = vadd.f32 %v847_v63, %v365_v32  ;;  %v969_v45 = vadd.f32 %v887_v0, %v381_v39 }
  0xc8   : > { %v1084_v18 = vld [vmem:[#allocation2 + $0x118] sm:$0xff]  ;;  %1360 = vst.msk [vmem:[%s2019_s6 + $0xc8] sm:$0xf] %vm1309_vm3, %v1295_v23  ;;  %v1264_v29 = vpack.c.bf16 %v1200_v24, %v1200_v24  ;;  %v922_v48 = vadd.f32 %v769_v5, %v334_v43  ;;  %v938_v49 = vadd.f32 %v809_v6, %v350_v30 }
  0xc9   : > { %v1152_v21 = vadd.f32 %v1997_v46, %v1084_v18  ;;  %1313 = vst.msk [vmem:[%s2019_s6 + $0xc] sm:$0xf] %vm1309_vm3, %v1248_v26 }
  0xca   : > { %1329 = vst.msk [vmem:[%s2019_s6 + $0x4c] sm:$0xf] %vm1309_vm3, %v1264_v29 }
  0xcb   : > { %v1216_v27 = vmax.f32 %v1152_v21, 0.0  ;;  %1018 = vst.msk [vmem:[#allocation2 + $0x120] sm:$0xff] %vm264_vm2, %v953_v44  ;;  %v1100_v62 = vld [vmem:[#allocation2 + $0x198] sm:$0xff] }
  0xcc   : > { %1034 = vst.msk [vmem:[#allocation2 + $0x1a0] sm:$0xff] %vm264_vm2, %v969_v45  ;;  %v1168_v0 = vadd.f32 %v1997_v46, %v1100_v62  ;;  %v1053_v1 = vld [vmem:[#allocation2 + $0x20] sm:$0xff] }
  0xcd   : > { %v1280_v37 = vpack.c.bf16 %v1216_v27, %v1216_v27  ;;  %987 = vst.msk [vmem:[#allocation2 + $0x28] sm:$0xff] %vm264_vm2, %v922_v48  ;;  %v1121_v3 = vadd.f32 %v1997_v46, %v1053_v1  ;;  %v1069_v4 = vld [vmem:[#allocation2 + $0xa0] sm:$0xff] }
  0xce   : > { %v849_v33 = vpop.f32.mrf.mxu2  ;;  %v889_v36 = vpop.f32.mrf.mxu3  ;;  %1003 = vst.msk [vmem:[#allocation2 + $0xa8] sm:$0xff] %vm264_vm2, %v938_v49  ;;  %v1232_v6 = vmax.f32 %v1168_v0, 0.0  ;;  %v1137_v7 = vadd.f32 %v1997_v46, %v1069_v4  ;;  %v368_v0 = vld [vmem:[#allocation2 + $0x138] sm:$0xff] }
  0xcf   : > { %v772_v40 = vpop.f32.mrf.mxu0  ;;  %v812_v41 = vpop.f32.mrf.mxu1  ;;  %1345 = vst.msk [vmem:[%s2019_s6 + $0x8c] sm:$0xf] %vm1309_vm3, %v1280_v37  ;;  %v954_v35 = vadd.f32 %v849_v33, %v366_v47  ;;  %v970_v52 = vadd.f32 %v889_v36, %v382_v34  ;;  %v1185_v9 = vmax.f32 %v1121_v3, 0.0  ;;  %v384_v3 = vld [vmem:[#allocation2 + $0x1b8] sm:$0xff] }
  0xd0   : > { %v923_v56 = vadd.f32 %v772_v40, %v335_v50  ;;  %v939_v60 = vadd.f32 %v812_v41, %v351_v51  ;;  %v1296_v12 = vpack.c.bf16 %v1232_v6, %v1232_v6  ;;  %v1201_v13 = vmax.f32 %v1137_v7, 0.0  ;;  %v337_v6 = vld [vmem:[#allocation2 + $0x40] sm:$0xff] }
  0xd1   : > { %1019 = vst.msk [vmem:[#allocation2 + $0x128] sm:$0xff] %vm264_vm2, %v954_v35  ;;  %v1249_v18 = vpack.c.bf16 %v1185_v9, %v1185_v9  ;;  %v353_v9 = vld [vmem:[#allocation2 + $0xc0] sm:$0xff] }
  0xd2   : > { %1035 = vst.msk [vmem:[#allocation2 + $0x1a8] sm:$0xff] %vm264_vm2, %v970_v52  ;;  %v1085_v8 = vld [vmem:[#allocation2 + $0x120] sm:$0xff]  ;;  %v1265_v24 = vpack.c.bf16 %v1201_v13, %v1201_v13 }
  0xd3   : > { %988 = vst.msk [vmem:[#allocation2 + $0x30] sm:$0xff] %vm264_vm2, %v923_v56  ;;  %v1153_v10 = vadd.f32 %v1997_v46, %v1085_v8  ;;  %v1101_v11 = vld [vmem:[#allocation2 + $0x1a0] sm:$0xff] }
  0xd4   : > { %1004 = vst.msk [vmem:[#allocation2 + $0xb0] sm:$0xff] %vm264_vm2, %v939_v60  ;;  %v1169_v14 = vadd.f32 %v1997_v46, %v1101_v11  ;;  %v1054_v15 = vld [vmem:[#allocation2 + $0x28] sm:$0xff]  ;;  %v369_v11 = vld [vmem:[#allocation2 + $0x140] sm:$0xff] }
  0xd5   : > { %v1217_v19 = vmax.f32 %v1153_v10, 0.0  ;;  %v1122_v20 = vadd.f32 %v1997_v46, %v1054_v15  ;;  %v1070_v21 = vld [vmem:[#allocation2 + $0xa8] sm:$0xff]  ;;  %1361 = vst.msk [vmem:[%s2019_s6 + $0xcc] sm:$0xf] %vm1309_vm3, %v1296_v12  ;;  %v385_v13 = vld [vmem:[#allocation2 + $0x1c0] sm:$0xff] }
  0xd6   : > { %v852_v54 = vpop.f32.mrf.mxu2  ;;  %v892_v55 = vpop.f32.mrf.mxu3  ;;  %v1233_v25 = vmax.f32 %v1169_v14, 0.0  ;;  %v1138_v26 = vadd.f32 %v1997_v46, %v1070_v21  ;;  %1314 = vst.msk [vmem:[%s2019_s6 + $0x10] sm:$0xf] %vm1309_vm3, %v1249_v18  ;;  %v338_v14 = vld [vmem:[#allocation2 + $0x48] sm:$0xff] }
  0xd7   : > { %v774_v58 = vpop.f32.mrf.mxu0  ;;  %v2110_v59 = vpop.f32.mrf.mxu1  ;;  %v955_v63 = vadd.f32 %v852_v54, %v367_v53  ;;  %v971_v2 = vadd.f32 %v892_v55, %v383_v57  ;;  %v1281_v28 = vpack.c.bf16 %v1217_v19, %v1217_v19  ;;  %v1186_v29 = vmax.f32 %v1122_v20, 0.0  ;;  %1330 = vst.msk [vmem:[%s2019_s6 + $0x50] sm:$0xf] %vm1309_vm3, %v1265_v24  ;;  %v354_v19 = vld [vmem:[#allocation2 + $0xc8] sm:$0xff] }
  0xd8   : > { %v924_v5 = vadd.f32 %v774_v58, %v336_v61  ;;  %v1086_v27 = vld [vmem:[#allocation2 + $0x128] sm:$0xff]  ;;  %v1297_v33 = vpack.c.bf16 %v1233_v25, %v1233_v25  ;;  %v1202_v36 = vmax.f32 %v1138_v26, 0.0  ;;  %v352_v58 = vld [vmem:[#allocation2 + $0xb8] sm:$0xff]  ;;  %v339_v26 = vld [vmem:[#allocation2 + $0x50] sm:$0xff] }
  0xd9   : > { %1020 = vst.msk [vmem:[#allocation2 + $0x130] sm:$0xff] %vm264_vm2, %v955_v63  ;;  %v1154_v31 = vadd.f32 %v1997_v46, %v1086_v27  ;;  %v1102_v32 = vld [vmem:[#allocation2 + $0x1a8] sm:$0xff]  ;;  %v1250_v39 = vpack.c.bf16 %v1186_v29, %v1186_v29 }
  0xda   : > { %1036 = vst.msk [vmem:[#allocation2 + $0x1b0] sm:$0xff] %vm264_vm2, %v971_v2  ;;  %v1170_v37 = vadd.f32 %v1997_v46, %v1102_v32  ;;  %v1055_v38 = vld [vmem:[#allocation2 + $0x30] sm:$0xff]  ;;  %v1266_v43 = vpack.c.bf16 %v1202_v36, %v1202_v36  ;;  %v370_v24 = vld [vmem:[#allocation2 + $0x148] sm:$0xff] }
  0xdb   : > { %989 = vst.msk [vmem:[#allocation2 + $0x38] sm:$0xff] %vm264_vm2, %v924_v5  ;;  %v1218_v40 = vmax.f32 %v1154_v31, 0.0  ;;  %v1123_v41 = vadd.f32 %v1997_v46, %v1055_v38  ;;  %v1071_v42 = vld [vmem:[#allocation2 + $0xb0] sm:$0xff]  ;;  %v940_v5 = vadd.f32 %v2110_v59, %v352_v58  ;;  %v386_v25 = vld [vmem:[#allocation2 + $0x1c8] sm:$0xff] }
  0xdc   : > { %1346 = vst.msk [vmem:[%s2019_s6 + $0x90] sm:$0xf] %vm1309_vm3, %v1281_v28  ;;  %v1234_v44 = vmax.f32 %v1170_v37, 0.0  ;;  %v1139_v30 = vadd.f32 %v1997_v46, %v1071_v42  ;;  %v355_v28 = vld [vmem:[#allocation2 + $0xd0] sm:$0xff] }
  0xdd   : > { %1362 = vst.msk [vmem:[%s2019_s6 + $0xd0] sm:$0xf] %vm1309_vm3, %v1297_v33  ;;  %v1282_v47 = vpack.c.bf16 %v1218_v40, %v1218_v40  ;;  %v1187_v48 = vmax.f32 %v1123_v41, 0.0  ;;  %v371_v31 = vld [vmem:[#allocation2 + $0x150] sm:$0xff] }
  0xde   : > { %v2124_v16 = vpop.f32.mrf.mxu2  ;;  %v2126_v17 = vpop.f32.mrf.mxu3  ;;  %1315 = vst.msk [vmem:[%s2019_s6 + $0x14] sm:$0xf] %vm1309_vm3, %v1250_v39  ;;  %v1298_v50 = vpack.c.bf16 %v1234_v44, %v1234_v44  ;;  %v1203_v35 = vmax.f32 %v1139_v30, 0.0 }
  0xdf   : > { %v2130_v22 = vpop.f32.mrf.mxu0  ;;  %v2132_v23 = vpop.f32.mrf.mxu1  ;;  %1331 = vst.msk [vmem:[%s2019_s6 + $0x54] sm:$0xf] %vm1309_vm3, %v1266_v43  ;;  %v1251_v55 = vpack.c.bf16 %v1187_v48, %v1187_v48  ;;  %v956_v8 = vadd.f32 %v2124_v16, %v368_v0  ;;  %v972_v10 = vadd.f32 %v2126_v17, %v384_v3 }
  0xe0   : > { %v1087_v45 = vld [vmem:[#allocation2 + $0x130] sm:$0xff]  ;;  %1347 = vst.msk [vmem:[%s2019_s6 + $0x94] sm:$0xf] %vm1309_vm3, %v1282_v47  ;;  %v1267_v62 = vpack.c.bf16 %v1203_v35, %v1203_v35  ;;  %v925_v12 = vadd.f32 %v2130_v22, %v337_v6  ;;  %v941_v59 = vadd.f32 %v2132_v23, %v353_v9 }
  0xe1   : > { %v1155_v34 = vadd.f32 %v1997_v46, %v1087_v45  ;;  %v1103_v49 = vld [vmem:[#allocation2 + $0x1b0] sm:$0xff]  ;;  %1363 = vst.msk [vmem:[%s2019_s6 + $0xd4] sm:$0xf] %vm1309_vm3, %v1298_v50 }
  0xe2   : > { %v1171_v51 = vadd.f32 %v1997_v46, %v1103_v49  ;;  %v1056_v52 = vld [vmem:[#allocation2 + $0x38] sm:$0xff]  ;;  %1316 = vst.msk [vmem:[%s2019_s6 + $0x18] sm:$0xf] %vm1309_vm3, %v1251_v55 }
  0xe3   : > { %v1219_v56 = vmax.f32 %v1155_v34, 0.0  ;;  %v1124_v57 = vadd.f32 %v1997_v46, %v1056_v52  ;;  %1332 = vst.msk [vmem:[%s2019_s6 + $0x58] sm:$0xf] %vm1309_vm3, %v1267_v62 }
  0xe4   : > { %v1235_v63 = vmax.f32 %v1171_v51, 0.0  ;;  %1005 = vst.msk [vmem:[#allocation2 + $0xb8] sm:$0xff] %vm264_vm2, %v940_v5 }
  0xe5   : > { %v1283_v1 = vpack.c.bf16 %v1219_v56, %v1219_v56  ;;  %v1188_v2 = vmax.f32 %v1124_v57, 0.0  ;;  %1021 = vst.msk [vmem:[#allocation2 + $0x138] sm:$0xff] %vm264_vm2, %v956_v8 }
  0xe6   : > { %v857_v53 = vpop.f32.mrf.mxu2  ;;  %v897_v54 = vpop.f32.mrf.mxu3  ;;  %v1299_v4 = vpack.c.bf16 %v1235_v63, %v1235_v63  ;;  %1037 = vst.msk [vmem:[#allocation2 + $0x1b8] sm:$0xff] %vm264_vm2, %v972_v10 }
  0xe7   : > { %v779_v60 = vpop.f32.mrf.mxu0  ;;  %v819_v61 = vpop.f32.mrf.mxu1  ;;  %1348 = vst.msk [vmem:[%s2019_s6 + $0x98] sm:$0xf] %vm1309_vm3, %v1283_v1  ;;  %v1252_v7 = vpack.c.bf16 %v1188_v2, %v1188_v2  ;;  %v957_v16 = vadd.f32 %v857_v53, %v369_v11  ;;  %v973_v17 = vadd.f32 %v897_v54, %v385_v13 }
  0xe8   : > { %1364 = vst.msk [vmem:[%s2019_s6 + $0xd8] sm:$0xf] %vm1309_vm3, %v1299_v4  ;;  %v926_v22 = vadd.f32 %v779_v60, %v338_v14  ;;  %v942_v23 = vadd.f32 %v819_v61, %v354_v19 }
  0xe9   : > { %1317 = vst.msk [vmem:[%s2019_s6 + $0x1c] sm:$0xf] %vm1309_vm3, %v1252_v7 }
  0xea   : > { %990 = vst.msk [vmem:[#allocation2 + $0x40] sm:$0xff] %vm264_vm2, %v925_v12 }
  0xeb   : > { %1006 = vst.msk [vmem:[#allocation2 + $0xc0] sm:$0xff] %vm264_vm2, %v941_v59  ;;  %v1072_v32 = vld [vmem:[#allocation2 + $0xb8] sm:$0xff] }
  0xec   : > { %1022 = vst.msk [vmem:[#allocation2 + $0x140] sm:$0xff] %vm264_vm2, %v957_v16  ;;  %v1140_v36 = vadd.f32 %v1997_v46, %v1072_v32  ;;  %v1088_v37 = vld [vmem:[#allocation2 + $0x138] sm:$0xff] }
  0xed   : > { %1038 = vst.msk [vmem:[#allocation2 + $0x1c0] sm:$0xff] %vm264_vm2, %v973_v17  ;;  %v1156_v41 = vadd.f32 %v1997_v46, %v1088_v37  ;;  %v1104_v42 = vld [vmem:[#allocation2 + $0x1b8] sm:$0xff] }
  0xee   : > { %v859_v15 = vpop.f32.mrf.mxu2  ;;  %v899_v18 = vpop.f32.mrf.mxu3  ;;  %991 = vst.msk [vmem:[#allocation2 + $0x48] sm:$0xff] %vm264_vm2, %v926_v22  ;;  %v1204_v30 = vmax.f32 %v1140_v36, 0.0  ;;  %v1172_v45 = vadd.f32 %v1997_v46, %v1104_v42  ;;  %v372_v42 = vld [vmem:[#allocation2 + $0x158] sm:$0xff] }
  0xef   : > { %v782_v20 = vpop.f32.mrf.mxu0  ;;  %v822_v21 = vpop.f32.mrf.mxu1  ;;  %v958_v27 = vadd.f32 %v859_v15, %v370_v24  ;;  %v974_v29 = vadd.f32 %v899_v18, %v386_v25  ;;  %1007 = vst.msk [vmem:[#allocation2 + $0xc8] sm:$0xff] %vm264_vm2, %v942_v23  ;;  %v1220_v48 = vmax.f32 %v1156_v41, 0.0 }
  0xf0   : > { %v927_v33 = vadd.f32 %v782_v20, %v339_v26  ;;  %v943_v38 = vadd.f32 %v822_v21, %v355_v28  ;;  %v1268_v35 = vpack.c.bf16 %v1204_v30, %v1204_v30  ;;  %v1236_v51 = vmax.f32 %v1172_v45, 0.0  ;;  %v387_v28 = vld [vmem:[#allocation2 + $0x1d0] sm:$0xff] }
  0xf1   : > { %1023 = vst.msk [vmem:[#allocation2 + $0x148] sm:$0xff] %vm264_vm2, %v958_v27  ;;  %v1057_v47 = vld [vmem:[#allocation2 + $0x40] sm:$0xff]  ;;  %v1284_v54 = vpack.c.bf16 %v1220_v48, %v1220_v48  ;;  %v388_v48 = vld [vmem:[#allocation2 + $0x1d8] sm:$0xff] }
  0xf2   : > { %1039 = vst.msk [vmem:[#allocation2 + $0x1c8] sm:$0xff] %vm264_vm2, %v974_v29  ;;  %v1125_v34 = vadd.f32 %v1997_v46, %v1057_v47  ;;  %v1073_v49 = vld [vmem:[#allocation2 + $0xc0] sm:$0xff]  ;;  %v1300_v58 = vpack.c.bf16 %v1236_v51, %v1236_v51 }
  0xf3   : > { %992 = vst.msk [vmem:[#allocation2 + $0x50] sm:$0xff] %vm264_vm2, %v927_v33  ;;  %v1141_v52 = vadd.f32 %v1997_v46, %v1073_v49  ;;  %v1089_v53 = vld [vmem:[#allocation2 + $0x140] sm:$0xff]  ;;  %v340_v33 = vld [vmem:[#allocation2 + $0x58] sm:$0xff] }
  0xf4   : > { %1008 = vst.msk [vmem:[#allocation2 + $0xd0] sm:$0xff] %vm264_vm2, %v943_v38  ;;  %v1189_v55 = vmax.f32 %v1125_v34, 0.0  ;;  %v1157_v56 = vadd.f32 %v1997_v46, %v1089_v53  ;;  %v1105_v57 = vld [vmem:[#allocation2 + $0x1c0] sm:$0xff]  ;;  %v356_v38 = vld [vmem:[#allocation2 + $0xd8] sm:$0xff] }
  0xf5   : > { %1333 = vst.msk [vmem:[%s2019_s6 + $0x5c] sm:$0xf] %vm1309_vm3, %v1268_v35  ;;  %v1205_v60 = vmax.f32 %v1141_v52, 0.0  ;;  %v1173_v61 = vadd.f32 %v1997_v46, %v1105_v57  ;;  %v1058_v62 = vld [vmem:[#allocation2 + $0x48] sm:$0xff]  ;;  %v341_v49 = vld [vmem:[#allocation2 + $0x60] sm:$0xff] }
  0xf6   : > { %v862_v39 = vpop.f32.mrf.mxu2  ;;  %v2185_v40 = vpop.f32.mrf.mxu3  ;;  %1349 = vst.msk [vmem:[%s2019_s6 + $0x9c] sm:$0xf] %vm1309_vm3, %v1284_v54  ;;  %v1253_v63 = vpack.c.bf16 %v1189_v55, %v1189_v55  ;;  %v1221_v0 = vmax.f32 %v1157_v56, 0.0  ;;  %v1126_v1 = vadd.f32 %v1997_v46, %v1058_v62  ;;  %v1074_v2 = vld [vmem:[#allocation2 + $0xc8] sm:$0xff]  ;;  %v357_v52 = vld [vmem:[#allocation2 + $0xe0] sm:$0xff] }
  0xf7   : > { %v959_v43 = vadd.f32 %v862_v39, %v371_v31  ;;  %v2189_v44 = vpop.f32.mrf.mxu0  ;;  %v2195_v50 = vpop.f32.mrf.mxu1  ;;  %1365 = vst.msk [vmem:[%s2019_s6 + $0xdc] sm:$0xf] %vm1309_vm3, %v1300_v58  ;;  %v1269_v3 = vpack.c.bf16 %v1205_v60, %v1205_v60  ;;  %v1237_v4 = vmax.f32 %v1173_v61, 0.0  ;;  %v1142_v5 = vadd.f32 %v1997_v46, %v1074_v2  ;;  %v373_v53 = vld [vmem:[#allocation2 + $0x160] sm:$0xff]  ;;  %v342_v56 = vld [vmem:[#allocation2 + $0x68] sm:$0xff] }
  0xf8   : > { %v1090_v6 = vld [vmem:[#allocation2 + $0x148] sm:$0xff]  ;;  %1318 = vst.msk [vmem:[%s2019_s6 + $0x20] sm:$0xf] %vm1309_vm3, %v1253_v63  ;;  %v1285_v9 = vpack.c.bf16 %v1221_v0, %v1221_v0  ;;  %v1190_v10 = vmax.f32 %v1126_v1, 0.0  ;;  %v975_v41 = vadd.f32 %v2185_v40, %v387_v28  ;;  %v928_v47 = vadd.f32 %v2189_v44, %v340_v33  ;;  %v389_v55 = vld [vmem:[#allocation2 + $0x1e0] sm:$0xff] }
  0xf9   : > { %1024 = vst.msk [vmem:[#allocation2 + $0x150] sm:$0xff] %vm264_vm2, %v959_v43  ;;  %v1158_v11 = vadd.f32 %v1997_v46, %v1090_v6  ;;  %v1106_v12 = vld [vmem:[#allocation2 + $0x1c8] sm:$0xff]  ;;  %v1301_v59 = vpack.c.bf16 %v1237_v4, %v1237_v4  ;;  %v1206_v14 = vmax.f32 %v1142_v5, 0.0  ;;  %v944_v34 = vadd.f32 %v2195_v50, %v356_v38 }
  0xfa   : > { %1334 = vst.msk [vmem:[%s2019_s6 + $0x60] sm:$0xf] %vm1309_vm3, %v1269_v3  ;;  %v1174_v15 = vadd.f32 %v1997_v46, %v1106_v12  ;;  %v1059_v18 = vld [vmem:[#allocation2 + $0x50] sm:$0xff]  ;;  %v1254_v16 = vpack.c.bf16 %v1190_v10, %v1190_v10  ;;  %v358_v57 = vld [vmem:[#allocation2 + $0xe8] sm:$0xff] }
  0xfb   : > { %1350 = vst.msk [vmem:[%s2019_s6 + $0xa0] sm:$0xf] %vm1309_vm3, %v1285_v9  ;;  %v1222_v19 = vmax.f32 %v1158_v11, 0.0  ;;  %v1127_v20 = vadd.f32 %v1997_v46, %v1059_v18  ;;  %v1075_v21 = vld [vmem:[#allocation2 + $0xd0] sm:$0xff]  ;;  %v1270_v17 = vpack.c.bf16 %v1206_v14, %v1206_v14  ;;  %v374_v61 = vld [vmem:[#allocation2 + $0x168] sm:$0xff] }
  0xfc   : > { %1366 = vst.msk [vmem:[%s2019_s6 + $0xe0] sm:$0xf] %vm1309_vm3, %v1301_v59  ;;  %v1238_v24 = vmax.f32 %v1174_v15, 0.0  ;;  %v1143_v22 = vadd.f32 %v1997_v46, %v1075_v21  ;;  %v390_v0 = vld [vmem:[#allocation2 + $0x1e8] sm:$0xff]  ;;  %v343_v3 = vld [vmem:[#allocation2 + $0x70] sm:$0xff] }
  0xfd   : > { %1319 = vst.msk [vmem:[%s2019_s6 + $0x24] sm:$0xf] %vm1309_vm3, %v1254_v16  ;;  %v1286_v23 = vpack.c.bf16 %v1222_v19, %v1222_v19  ;;  %v1191_v26 = vmax.f32 %v1127_v20, 0.0 }
  0xfe   : > { %v864_v7 = vpop.f32.mrf.mxu2  ;;  %v904_v8 = vpop.f32.mrf.mxu3  ;;  %1335 = vst.msk [vmem:[%s2019_s6 + $0x64] sm:$0xf] %vm1309_vm3, %v1270_v17  ;;  %v1302_v31 = vpack.c.bf16 %v1238_v24, %v1238_v24  ;;  %v1207_v32 = vmax.f32 %v1143_v22, 0.0 }
  0xff   : > { %v787_v13 = vpop.f32.mrf.mxu0  ;;  %v827_v29 = vpop.f32.mrf.mxu1  ;;  %1351 = vst.msk [vmem:[%s2019_s6 + $0xa4] sm:$0xf] %vm1309_vm3, %v1286_v23  ;;  %v1255_v36 = vpack.c.bf16 %v1191_v26, %v1191_v26  ;;  %v960_v51 = vadd.f32 %v864_v7, %v372_v42  ;;  %v976_v40 = vadd.f32 %v904_v8, %v388_v48 }
 0x100   : > { %v1091_v25 = vld [vmem:[#allocation2 + $0x150] sm:$0xff]  ;;  %1367 = vst.msk [vmem:[%s2019_s6 + $0xe4] sm:$0xf] %vm1309_vm3, %v1302_v31  ;;  %v1271_v39 = vpack.c.bf16 %v1207_v32, %v1207_v32  ;;  %v929_v54 = vadd.f32 %v787_v13, %v341_v49  ;;  %v945_v44 = vadd.f32 %v827_v29, %v357_v52 }
 0x101   : > { %v1159_v27 = vadd.f32 %v1997_v46, %v1091_v25  ;;  %1320 = vst.msk [vmem:[%s2019_s6 + $0x28] sm:$0xf] %vm1309_vm3, %v1255_v36 }
 0x102   : > { %1336 = vst.msk [vmem:[%s2019_s6 + $0x68] sm:$0xf] %vm1309_vm3, %v1271_v39 }
 0x103   : > { %v1223_v37 = vmax.f32 %v1159_v27, 0.0  ;;  %1040 = vst.msk [vmem:[#allocation2 + $0x1d0] sm:$0xff] %vm264_vm2, %v975_v41 }
 0x104   : > { %993 = vst.msk [vmem:[#allocation2 + $0x58] sm:$0xff] %vm264_vm2, %v928_v47 }
 0x105   : > { %v1287_v45 = vpack.c.bf16 %v1223_v37, %v1223_v37  ;;  %1009 = vst.msk [vmem:[#allocation2 + $0xd8] sm:$0xff] %vm264_vm2, %v944_v34 }
 0x106   : > { %v867_v43 = vpop.f32.mrf.mxu2  ;;  %v907_v30 = vpop.f32.mrf.mxu3  ;;  %1025 = vst.msk [vmem:[#allocation2 + $0x158] sm:$0xff] %vm264_vm2, %v960_v51 }
 0x107   : > { %v789_v35 = vpop.f32.mrf.mxu0  ;;  %1352 = vst.msk [vmem:[%s2019_s6 + $0xa8] sm:$0xf] %vm1309_vm3, %v1287_v45  ;;  %v961_v50 = vadd.f32 %v867_v43, %v373_v53  ;;  %v829_v58 = vpop.f32.mrf.mxu1  ;;  %v977_v60 = vadd.f32 %v907_v30, %v389_v55 }
 0x108   : > { %1041 = vst.msk [vmem:[#allocation2 + $0x1d8] sm:$0xff] %vm264_vm2, %v976_v40  ;;  %v930_v63 = vadd.f32 %v789_v35, %v342_v56  ;;  %v946_v2 = vadd.f32 %v829_v58, %v358_v57 }
 0x109   : > { %994 = vst.msk [vmem:[#allocation2 + $0x60] sm:$0xff] %vm264_vm2, %v929_v54 }
 0x10a   : > { %1010 = vst.msk [vmem:[#allocation2 + $0xe0] sm:$0xff] %vm264_vm2, %v945_v44  ;;  %v1107_v4 = vld [vmem:[#allocation2 + $0x1d0] sm:$0xff] }
 0x10b   : > { %1026 = vst.msk [vmem:[#allocation2 + $0x160] sm:$0xff] %vm264_vm2, %v961_v50  ;;  %v1175_v6 = vadd.f32 %v1997_v46, %v1107_v4  ;;  %v1060_v7 = vld [vmem:[#allocation2 + $0x58] sm:$0xff]  ;;  %v391_v4 = vld [vmem:[#allocation2 + $0x1f0] sm:$0xff] }
 0x10c   : > { %1042 = vst.msk [vmem:[#allocation2 + $0x1e0] sm:$0xff] %vm264_vm2, %v977_v60  ;;  %v1128_v10 = vadd.f32 %v1997_v46, %v1060_v7  ;;  %v1076_v11 = vld [vmem:[#allocation2 + $0xd8] sm:$0xff] }
 0x10d   : > { %995 = vst.msk [vmem:[#allocation2 + $0x68] sm:$0xff] %vm264_vm2, %v930_v63  ;;  %v1239_v13 = vmax.f32 %v1175_v6, 0.0  ;;  %v1144_v59 = vadd.f32 %v1997_v46, %v1076_v11  ;;  %v1092_v14 = vld [vmem:[#allocation2 + $0x158] sm:$0xff]  ;;  %v359_v63 = vld [vmem:[#allocation2 + $0xf0] sm:$0xff] }
 0x10e   : > { %v869_v62 = vpop.f32.mrf.mxu2  ;;  %v909_v1 = vpop.f32.mrf.mxu3  ;;  %1011 = vst.msk [vmem:[#allocation2 + $0xe8] sm:$0xff] %vm264_vm2, %v946_v2  ;;  %v1192_v15 = vmax.f32 %v1128_v10, 0.0  ;;  %v1160_v18 = vadd.f32 %v1997_v46, %v1092_v14  ;;  %v375_v2 = vld [vmem:[#allocation2 + $0x170] sm:$0xff]  ;;  %v344_v7 = vld [vmem:[#allocation2 + $0x78] sm:$0xff] }
 0x10f   : > { %v962_v5 = vadd.f32 %v869_v62, %v374_v61  ;;  %v978_v8 = vadd.f32 %v909_v1, %v390_v0  ;;  %v792_v9 = vpop.f32.mrf.mxu0  ;;  %v1108_v16 = vld [vmem:[#allocation2 + $0x1d8] sm:$0xff]  ;;  %v1303_v19 = vpack.c.bf16 %v1239_v13, %v1239_v13  ;;  %v1208_v20 = vmax.f32 %v1144_v59, 0.0  ;;  %v832_v37 = vpop.f32.mrf.mxu1  ;;  %v1744_v61 = vld [vmem:[%s2330_s2] ss:$0 sm:$0xff] }
 0x110   : > { %v931_v12 = vadd.f32 %v792_v9, %v343_v3  ;;  %v1176_v21 = vadd.f32 %v1997_v46, %v1108_v16  ;;  %v1061_v17 = vld [vmem:[#allocation2 + $0x60] sm:$0xff]  ;;  %v1256_v24 = vpack.c.bf16 %v1192_v15, %v1192_v15  ;;  %v1224_v22 = vmax.f32 %v1160_v18, 0.0  ;;  %v360_v11 = vld [vmem:[#allocation2 + $0xf8] sm:$0xff] }
 0x111   : > { %1027 = vst.msk [vmem:[#allocation2 + $0x168] sm:$0xff] %vm264_vm2, %v962_v5  ;;  %v1129_v25 = vadd.f32 %v1997_v46, %v1061_v17  ;;  %v1077_v23 = vld [vmem:[#allocation2 + $0xe0] sm:$0xff]  ;;  %v1272_v26 = vpack.c.bf16 %v1208_v20, %v1208_v20  ;;  %v947_v6 = vadd.f32 %v832_v37, %v359_v63  ;;  %v376_v59 = vld [vmem:[#allocation2 + $0x178] sm:$0xff] }
 0x112   : > { %1043 = vst.msk [vmem:[#allocation2 + $0x1e8] sm:$0xff] %vm264_vm2, %v978_v8  ;;  %v1240_v27 = vmax.f32 %v1176_v21, 0.0  ;;  %v1145_v28 = vadd.f32 %v1997_v46, %v1077_v23  ;;  %v1093_v29 = vld [vmem:[#allocation2 + $0x160] sm:$0xff]  ;;  %v1288_v31 = vpack.c.bf16 %v1224_v22, %v1224_v22  ;;  %v392_v18 = vld [vmem:[#allocation2 + $0x1f8] sm:$0xff] }
 0x113   : > { %996 = vst.msk [vmem:[#allocation2 + $0x70] sm:$0xff] %vm264_vm2, %v931_v12  ;;  %v1193_v32 = vmax.f32 %v1129_v25, 0.0  ;;  %v1161_v33 = vadd.f32 %v1997_v46, %v1093_v29  ;;  %v1109_v36 = vld [vmem:[#allocation2 + $0x1e0] sm:$0xff] }
 0x114   : > { %1368 = vst.msk [vmem:[%s2019_s6 + $0xe8] sm:$0xf] %vm1309_vm3, %v1303_v19  ;;  %v1304_v38 = vpack.c.bf16 %v1240_v27, %v1240_v27  ;;  %v1209_v39 = vmax.f32 %v1145_v28, 0.0  ;;  %v1177_v41 = vadd.f32 %v1997_v46, %v1109_v36  ;;  %v1062_v42 = vld [vmem:[#allocation2 + $0x68] sm:$0xff] }
 0x115   : > { %1321 = vst.msk [vmem:[%s2019_s6 + $0x2c] sm:$0xf] %vm1309_vm3, %v1256_v24  ;;  %v1257_v30 = vpack.c.bf16 %v1193_v32, %v1193_v32  ;;  %v1225_v45 = vmax.f32 %v1161_v33, 0.0  ;;  %v1130_v47 = vadd.f32 %v1997_v46, %v1062_v42  ;;  %v1078_v48 = vld [vmem:[#allocation2 + $0xe8] sm:$0xff] }
 0x116   : > { %1337 = vst.msk [vmem:[%s2019_s6 + $0x6c] sm:$0xf] %vm1309_vm3, %v1272_v26  ;;  %v872_v43 = vpop.f32.mrf.mxu2  ;;  %v912_v34 = vpop.f32.mrf.mxu3  ;;  %v1273_v49 = vpack.c.bf16 %v1209_v39, %v1209_v39  ;;  %v1241_v35 = vmax.f32 %v1177_v41, 0.0  ;;  %v1146_v51 = vadd.f32 %v1997_v46, %v1078_v48 }
 0x117   : > { %1353 = vst.msk [vmem:[%s2019_s6 + $0xac] sm:$0xf] %vm1309_vm3, %v1288_v31  ;;  %v1289_v40 = vpack.c.bf16 %v1225_v45, %v1225_v45  ;;  %v1194_v53 = vmax.f32 %v1130_v47, 0.0  ;;  %v794_v8 = vpop.f32.mrf.mxu0  ;;  %v963_v10 = vadd.f32 %v872_v43, %v375_v2  ;;  %v834_v12 = vpop.f32.mrf.mxu1  ;;  %v979_v13 = vadd.f32 %v912_v34, %v391_v4 }
 0x118   : > { %1369 = vst.msk [vmem:[%s2019_s6 + $0xec] sm:$0xf] %vm1309_vm3, %v1304_v38  ;;  %v1094_v52 = vld [vmem:[#allocation2 + $0x168] sm:$0xff]  ;;  %v1305_v44 = vpack.c.bf16 %v1241_v35, %v1241_v35  ;;  %v1210_v56 = vmax.f32 %v1146_v51, 0.0  ;;  %v932_v15 = vadd.f32 %v794_v8, %v344_v7  ;;  %v948_v19 = vadd.f32 %v834_v12, %v360_v11 }
 0x119   : > { %1322 = vst.msk [vmem:[%s2019_s6 + $0x30] sm:$0xf] %vm1309_vm3, %v1257_v30  ;;  %v1162_v54 = vadd.f32 %v1997_v46, %v1094_v52  ;;  %v1110_v55 = vld [vmem:[#allocation2 + $0x1e8] sm:$0xff]  ;;  %v1258_v58 = vpack.c.bf16 %v1194_v53, %v1194_v53 }
 0x11a   : > { %1338 = vst.msk [vmem:[%s2019_s6 + $0x70] sm:$0xf] %vm1309_vm3, %v1273_v49  ;;  %v1178_v50 = vadd.f32 %v1997_v46, %v1110_v55  ;;  %v1063_v57 = vld [vmem:[#allocation2 + $0x70] sm:$0xff]  ;;  %v1274_v0 = vpack.c.bf16 %v1210_v56, %v1210_v56 }
 0x11b   : > { %1354 = vst.msk [vmem:[%s2019_s6 + $0xb0] sm:$0xf] %vm1309_vm3, %v1289_v40  ;;  %v1226_v60 = vmax.f32 %v1162_v54, 0.0  ;;  %v1131_v62 = vadd.f32 %v1744_v61, %v1063_v57 }
 0x11c   : > { %1370 = vst.msk [vmem:[%s2019_s6 + $0xf0] sm:$0xf] %vm1309_vm3, %v1305_v44  ;;  %v1242_v1 = vmax.f32 %v1178_v50, 0.0 }
 0x11d   : > { %1323 = vst.msk [vmem:[%s2019_s6 + $0x34] sm:$0xf] %vm1309_vm3, %v1258_v58  ;;  %v1290_v46 = vpack.c.bf16 %v1226_v60, %v1226_v60  ;;  %v1195_v3 = vmax.f32 %v1131_v62, 0.0 }
 0x11e   : > { %1339 = vst.msk [vmem:[%s2019_s6 + $0x74] sm:$0xf] %vm1309_vm3, %v1274_v0  ;;  %v1306_v5 = vpack.c.bf16 %v1242_v1, %v1242_v1  ;;  %v874_v14 = vpop.f32.mrf.mxu2  ;;  %v914_v16 = vpop.f32.mrf.mxu3 }
 0x11f   : > { %1355 = vst.msk [vmem:[%s2019_s6 + $0xb4] sm:$0xf] %vm1309_vm3, %v1290_v46  ;;  %v1259_v9 = vpack.c.bf16 %v1195_v3, %v1195_v3  ;;  %v964_v20 = vadd.f32 %v874_v14, %v376_v59  ;;  %v980_v21 = vadd.f32 %v914_v16, %v392_v18 }
 0x120   : > { %1371 = vst.msk [vmem:[%s2019_s6 + $0xf4] sm:$0xf] %vm1309_vm3, %v1306_v5 }
 0x121   : > { %1324 = vst.msk [vmem:[%s2019_s6 + $0x38] sm:$0xf] %vm1309_vm3, %v1259_v9 }
 0x122   : > { %1012 = vst.msk [vmem:[#allocation2 + $0xf0] sm:$0xff] %vm264_vm2, %v947_v6 }
 0x123   : > { %1028 = vst.msk [vmem:[#allocation2 + $0x170] sm:$0xff] %vm264_vm2, %v963_v10 }
 0x124   : > { %1044 = vst.msk [vmem:[#allocation2 + $0x1f0] sm:$0xff] %vm264_vm2, %v979_v13 }
 0x125   : > { %997 = vst.msk [vmem:[#allocation2 + $0x78] sm:$0xff] %vm264_vm2, %v932_v15 }
 0x126   : > { %1013 = vst.msk [vmem:[#allocation2 + $0xf8] sm:$0xff] %vm264_vm2, %v948_v19 }
 0x127   : > { %1029 = vst.msk [vmem:[#allocation2 + $0x178] sm:$0xff] %vm264_vm2, %v964_v20 }
 0x128   : > { %1045 = vst.msk [vmem:[#allocation2 + $0x1f8] sm:$0xff] %vm264_vm2, %v980_v21 }
 0x129   : > { %v1079_v17 = vld [vmem:[#allocation2 + $0xf0] sm:$0xff] }
 0x12a   : > { %v1147_v24 = vadd.f32 %v1744_v61, %v1079_v17  ;;  %v1095_v22 = vld [vmem:[#allocation2 + $0x170] sm:$0xff] }
 0x12b   : > { %v1163_v25 = vadd.f32 %v1744_v61, %v1095_v22  ;;  %v1111_v23 = vld [vmem:[#allocation2 + $0x1f0] sm:$0xff] }
 0x12c   : > { %v1211_v26 = vmax.f32 %v1147_v24, 0.0  ;;  %v1179_v27 = vadd.f32 %v1744_v61, %v1111_v23  ;;  %v1064_v28 = vld [vmem:[#allocation2 + $0x78] sm:$0xff] }
 0x12d   : > { %v1227_v29 = vmax.f32 %v1163_v25, 0.0  ;;  %v1132_v31 = vadd.f32 %v1744_v61, %v1064_v28  ;;  %v1080_v32 = vld [vmem:[#allocation2 + $0xf8] sm:$0xff] }
 0x12e   : > { %v1275_v33 = vpack.c.bf16 %v1211_v26, %v1211_v26  ;;  %v1243_v36 = vmax.f32 %v1179_v27, 0.0  ;;  %v1148_v37 = vadd.f32 %v1744_v61, %v1080_v32  ;;  %v1096_v38 = vld [vmem:[#allocation2 + $0x178] sm:$0xff] }
 0x12f   : > { %v1291_v39 = vpack.c.bf16 %v1227_v29, %v1227_v29  ;;  %v1196_v41 = vmax.f32 %v1132_v31, 0.0  ;;  %v1164_v42 = vadd.f32 %v1744_v61, %v1096_v38  ;;  %v1112_v43 = vld [vmem:[#allocation2 + $0x1f8] sm:$0xff] }
 0x130   : > { %1340 = vst.msk [vmem:[%s2019_s6 + $0x78] sm:$0xf] %vm1309_vm3, %v1275_v33  ;;  %v1307_v30 = vpack.c.bf16 %v1243_v36, %v1243_v36  ;;  %v1212_v45 = vmax.f32 %v1148_v37, 0.0  ;;  %v1180_v47 = vadd.f32 %v1744_v61, %v1112_v43 }
 0x131   : > { %1356 = vst.msk [vmem:[%s2019_s6 + $0xb8] sm:$0xf] %vm1309_vm3, %v1291_v39  ;;  %v1260_v48 = vpack.c.bf16 %v1196_v41, %v1196_v41  ;;  %v1228_v34 = vmax.f32 %v1164_v42, 0.0 }
 0x132   : > { %1372 = vst.msk [vmem:[%s2019_s6 + $0xf8] sm:$0xf] %vm1309_vm3, %v1307_v30  ;;  %v1276_v49 = vpack.c.bf16 %v1212_v45, %v1212_v45  ;;  %v1244_v35 = vmax.f32 %v1180_v47, 0.0 }
 0x133   : > { %1325 = vst.msk [vmem:[%s2019_s6 + $0x3c] sm:$0xf] %vm1309_vm3, %v1260_v48  ;;  %v1292_v51 = vpack.c.bf16 %v1228_v34, %v1228_v34 }
 0x134   : > { %1341 = vst.msk [vmem:[%s2019_s6 + $0x7c] sm:$0xf] %vm1309_vm3, %v1276_v49  ;;  %v1308_v52 = vpack.c.bf16 %v1244_v35, %v1244_v35 }
 0x135   : > { %1357 = vst.msk [vmem:[%s2019_s6 + $0xbc] sm:$0xf] %vm1309_vm3, %v1292_v51 }
 0x136   : > { %1373 = vst.msk [vmem:[%s2019_s6 + $0xfc] sm:$0xf] %vm1309_vm3, %v1308_v52 }
 0x137 PF: > { %s13_s14 = sadd.s32 1, %s1767_s14   ;;  %s2332_s12 = smov %s1763_s13 }
 0x138   : > { %p10_p5 = scmp.ge.s32.totalorder %s13_s14, 6   ;;  %s2333_s13 = smov %s2335_s15 }
 0x13a   :  { %12 = sbr.rel (!%p10_p5) target bundleno = 2 (0x2), region = 76 }

</bundles_post_ra>
